<compile_context>
chip_gen: v6e
topology: v6e:2x2x1
jax: 0.10.0
libtpu: 0.0.40
codegen_flags: <defaults>
</compile_context>

<pallas_src>
import functools

import jax
import jax.numpy as jnp
import numpy as np
from jax.experimental import pallas as pl
from jax.experimental.pallas import tpu as pltpu


def _round_up(x, m):
    return -(-x // m) * m


# ----------------------------------------------------------------------------- kernel
def _cost_kernel(logits_ref, onehot_ref, obox_ref, tboxT_ref,
                 winv_out_ref, winv_tgtT_ref, c_ref, *,
                 w_giou: float, compute_dtype):
    cdt = compute_dtype
    f32 = jnp.float32

    def wg(x):  # static specialization: skip the multiply when cost_giou == 1
        return x if w_giou == 1.0 else x * w_giou

    # ---- classification cost: cost_class * (-softmax(logits)[:, tgt_ids]) ------------
    # (-cost_class) is folded into the one-hot on the host; one MXU matmul (compute_dtype
    # operands, f32 accumulation) yields the weighted, negated class cost directly.
    logits = logits_ref[...]                                         # [TN, C] f32
    m = jnp.max(logits, axis=-1, keepdims=True)
    e = jnp.exp(logits - m)
    prob = e * pl.reciprocal(jnp.sum(e, axis=-1, keepdims=True), approx=True)
    c = jnp.dot(prob.astype(onehot_ref.dtype), onehot_ref[...],
                preferred_element_type=f32)                          # [TN, T] f32

    # ---- L1 bbox cost (cost_bbox folded into the host-side reciprocal image sizes) ----
    obox = obox_ref[...]                                             # [TN, 4] abs xyxy
    tboxT = tboxT_ref[...]                                           # [4, T]  abs xyxy
    ob_n = (obox * winv_out_ref[...]).astype(cdt)                    # [TN, 4] = w_bbox*box/img
    tb_n = (tboxT * winv_tgtT_ref[...]).astype(cdt)                  # [4, T]
    l1 = jnp.abs(ob_n[:, 0:1] - tb_n[0:1, :])                        # [TN, T] compute_dtype
    for k in range(1, 4):                                            # static unrolled loop
        l1 = l1 + jnp.abs(ob_n[:, k:k + 1] - tb_n[k:k + 1, :])
    c = c + l1.astype(f32)

    # ---- generalized IoU cost on absolute boxes ---------------------------------------
    ob_c = obox.astype(cdt)                                          # [TN, 4]
    tb_c = tboxT.astype(cdt)                                         # [4, T]
    tile = (obox_ref.shape[0], tboxT_ref.shape[1])                   # static block shape

    # Hoist the 8 corner broadcasts (each used by both inter and enc; broadcasts are not
    # CSE'd, so doing them once halves the XLU lane/sublane-broadcast work).
    ox1 = jnp.broadcast_to(ob_c[:, 0:1], tile)
    oy1 = jnp.broadcast_to(ob_c[:, 1:2], tile)
    ox2 = jnp.broadcast_to(ob_c[:, 2:3], tile)
    oy2 = jnp.broadcast_to(ob_c[:, 3:4], tile)
    tx1 = jnp.broadcast_to(tb_c[0:1, :], tile)
    ty1 = jnp.broadcast_to(tb_c[1:2, :], tile)
    tx2 = jnp.broadcast_to(tb_c[2:3, :], tile)
    ty2 = jnp.broadcast_to(tb_c[3:4, :], tile)

    # Per-box areas on the narrow [TN,1] / [1,T] shapes (cheap), broadcast once in union.
    area1 = (ob_c[:, 2:3] - ob_c[:, 0:1]) * (ob_c[:, 3:4] - ob_c[:, 1:2])   # [TN, 1]
    area2 = (tb_c[2:3, :] - tb_c[0:1, :]) * (tb_c[3:4, :] - tb_c[1:2, :])   # [1, T]

    inter = (jnp.maximum(jnp.minimum(ox2, tx2) - jnp.maximum(ox1, tx1), 0.0) *
             jnp.maximum(jnp.minimum(oy2, ty2) - jnp.maximum(oy1, ty1), 0.0))   # [TN, T]
    union = (area1 + area2) - inter                                              # [TN, T]

    # Accumulate -iou first so `inter` dies before the enclosing box is built (fewer live
    # [TN,T] temporaries).  Divides go through approx EUP reciprocals in f32.
    # NOTE: degenerate disjoint boxes (union == 0) would give 0 * 1/0 = NaN, matching the
    # reference's 0/0 behavior; add an epsilon guard here if such boxes can occur.
    inter_f = inter.astype(f32)
    union_f = union.astype(f32)
    c = c - wg(inter_f * pl.reciprocal(union_f, approx=True))

    # Enclosing-box extents are non-negative by construction (max - min): no clamp needed.
    enc = ((jnp.maximum(ox2, tx2) - jnp.minimum(ox1, tx1)) *
           (jnp.maximum(oy2, ty2) - jnp.minimum(oy1, ty1)))                      # [TN, T]
    enc_f = enc.astype(f32)
    c = c + wg((enc_f - union_f) * pl.reciprocal(enc_f, approx=True))

    c_ref[...] = c.astype(c_ref.dtype)


# ----------------------------------------------------------------------------- glue
def _pad_cols(x, n_cols, fill_col):
    extra = n_cols - x.shape[1]
    if extra <= 0:
        return x
    pad = jnp.tile(jnp.asarray(fill_col, x.dtype)[:, None], (1, extra))
    return jnp.concatenate([x, pad], axis=1)


def _choose_tile_n(n, tile_n):
    """Largest N tile <= tile_n (multiple of 8, bounded by N); when the grid has more than
    one step, make the step count even so v7x's two TensorCores split it evenly."""
    tn = min(_round_up(max(n, 1), 8), _round_up(max(int(tile_n), 8), 8))
    steps = -(-n // tn)
    if steps > 1 and steps % 2 == 1:
        tn = _round_up(-(-n // (steps + 1)), 8)
    return max(tn, 8)


def _vmem_limit_bytes(tn, nc, t_p, compute_dtype, out_dtype):
    """Scoped-VMEM request derived from the actual block sizes (2x for double buffering)
    plus headroom for the live [TN, T] kernel temporaries."""
    cdt_b = jnp.dtype(compute_dtype).itemsize
    out_b = jnp.dtype(out_dtype).itemsize
    block_bytes = (tn * nc * 4            # logits tile
                   + nc * t_p * cdt_b     # one-hot (resident)
                   + tn * 4 * 4           # pred boxes tile
                   + 4 * t_p * 4          # target boxes^T (resident)
                   + tn * 4 * 4           # w_bbox/img per prediction tile
                   + 4 * t_p * 4          # w_bbox/img per target^T (resident)
                   + tn * t_p * out_b)    # output tile
    temp_bytes = 8 * tn * t_p * 4         # live [TN, T] intermediates (f32 worst case)
    want = 2 * block_bytes + temp_bytes + (2 << 20)
    # Never below the 32 MiB v6e/v7x scoped default; never above v7x's 64 MiB physical.
    return int(min(max(want, 32 << 20), 64 << 20))


def hungarian_cost_matrix(pred_logits, pred_boxes, tgt_ids, tgt_bbox,
                          image_size_out, image_size_tgt,
                          cost_class=1.0, cost_bbox=1.0, cost_giou=1.0,
                          tile_n=1024, compute_dtype=jnp.bfloat16,
                          out_dtype=jnp.float32):
    """Returns the dense matching cost C of shape [bs, num_queries, total_num_targets].

    compute_dtype: dtype of the [TN, T] elementwise math.  bfloat16 (default) roughly
        halves work on the binding VALU slot on v6e/v7x; use jnp.float32 on v5e (no bf16
        VPU) or when bit-accurate costs are required.
    out_dtype: cost-matrix storage dtype; bfloat16 halves the dominant HBM write stream
        (worthwhile on v5e/v7x), float32 (default) keeps the exact accumulated value.
    """
    bs, nq, nc = pred_logits.shape
    n = bs * nq
    t = int(tgt_ids.shape[0])

    # Prediction-side arrays: no host padding, the grid handles the N remainder
    # (garbage in a partial last block stays row-confined and is never read back).
    logits = pred_logits.reshape(n, nc).astype(jnp.float32)           # [N, C]
    obox = pred_boxes.reshape(n, 4).astype(jnp.float32)               # [N, 4]
    # cost_bbox folded into host-side reciprocal image sizes: in-kernel normalization is a
    # multiply, and the weight never touches a [TN, T] array.
    winv_out = float(cost_bbox) / image_size_out.astype(jnp.float32)  # [N, 4]

    # Target-side arrays are tiny: pad T to a lane-dense multiple of 128 with inert values
    # so padded columns stay finite (they are sliced away afterwards).
    t_p = _round_up(max(t, 1), 128)
    onehot = (-float(cost_class)) * jax.nn.one_hot(tgt_ids, nc, dtype=jnp.float32).T
    onehot = _pad_cols(onehot, t_p, [0.0] * nc).astype(compute_dtype)              # [C, T_p]
    tboxT = _pad_cols(tgt_bbox.astype(jnp.float32).T, t_p, [0.0, 0.0, 1.0, 1.0])   # [4, T_p]
    winv_tgtT = _pad_cols((float(cost_bbox) / image_size_tgt.astype(jnp.float32)).T,
                          t_p, [1.0, 1.0, 1.0, 1.0])                                # [4, T_p]

    tn = _choose_tile_n(n, tile_n)
    grid = (pl.cdiv(n, tn),)

    kernel = functools.partial(_cost_kernel,
                               w_giou=float(cost_giou),
                               compute_dtype=compute_dtype)

    c_padded = pl.pallas_call(
        kernel,
        out_shape=jax.ShapeDtypeStruct((n, t_p), out_dtype),
        grid=grid,
        in_specs=[
            pl.BlockSpec((tn, nc), lambda i: (i, 0)),     # logits            (tiled over N)
            pl.BlockSpec((nc, t_p), lambda i: (0, 0)),    # -w_class*onehot   (resident)
            pl.BlockSpec((tn, 4), lambda i: (i, 0)),      # pred boxes        (tiled over N)
            pl.BlockSpec((4, t_p), lambda i: (0, 0)),     # target boxes^T    (resident)
            pl.BlockSpec((tn, 4), lambda i: (i, 0)),      # w_bbox/img per prediction
            pl.BlockSpec((4, t_p), lambda i: (0, 0)),     # w_bbox/img per target^T
        ],
        out_specs=pl.BlockSpec((tn, t_p), lambda i: (i, 0)),
        compiler_params=pltpu.CompilerParams(
            dimension_semantics=("parallel",),            # megacore split of the N axis
            vmem_limit_bytes=_vmem_limit_bytes(tn, nc, t_p, compute_dtype, out_dtype),
        ),
    )(logits, onehot, obox, tboxT, winv_out, winv_tgtT)

    return c_padded[:, :t].reshape(bs, nq, t)


# ----------------------------------------------------------------------------- reference
def _reference_cost(pred_logits, pred_boxes, tgt_ids, tgt_bbox,
                    image_size_out, image_size_tgt,
                    cost_class=1.0, cost_bbox=1.0, cost_giou=1.0):
    bs, nq, nc = pred_logits.shape
    out_prob = jax.nn.softmax(pred_logits.reshape(-1, nc), axis=-1)
    out_bbox = pred_boxes.reshape(-1, 4)
    c_class = -out_prob[:, tgt_ids]
    ob = out_bbox / image_size_out
    tb = tgt_bbox / image_size_tgt
    c_bbox = jnp.sum(jnp.abs(ob[:, None, :] - tb[None, :, :]), axis=-1)

    area1 = (out_bbox[:, 2] - out_bbox[:, 0]) * (out_bbox[:, 3] - out_bbox[:, 1])
    area2 = (tgt_bbox[:, 2] - tgt_bbox[:, 0]) * (tgt_bbox[:, 3] - tgt_bbox[:, 1])
    lt = jnp.maximum(out_bbox[:, None, :2], tgt_bbox[None, :, :2])
    rb = jnp.minimum(out_bbox[:, None, 2:], tgt_bbox[None, :, 2:])
    wh = jnp.clip(rb - lt, 0.0)
    inter = wh[..., 0] * wh[..., 1]
    union = area1[:, None] + area2[None, :] - inter
    iou = inter / union
    lt_e = jnp.minimum(out_bbox[:, None, :2], tgt_bbox[None, :, :2])
    rb_e = jnp.maximum(out_bbox[:, None, 2:], tgt_bbox[None, :, 2:])
    wh_e = jnp.clip(rb_e - lt_e, 0.0)
    area_e = wh_e[..., 0] * wh_e[..., 1]
    giou = iou - (area_e - union) / area_e

    c = cost_bbox * c_bbox + cost_class * c_class + cost_giou * (-giou)
    return c.reshape(bs, nq, -1)


# ----------------------------------------------------------------------------- main
if __name__ == "__main__":
    key = jax.random.PRNGKey(0)
    bs, num_queries, num_classes = 2, 8, 32
    sizes = [3, 5]                                  # targets per image
    total_t = sum(sizes)
    img_wh = np.array([[640.0, 480.0], [512.0, 384.0]], dtype=np.float32)

    def make_boxes(k, n_boxes, wh):
        k1, k2 = jax.random.split(k)
        cxcy = jax.random.uniform(k1, (n_boxes, 2), minval=0.25, maxval=0.75)
        half = jax.random.uniform(k2, (n_boxes, 2), minval=0.05, maxval=0.2)
        x1y1 = (cxcy - half) * wh[None, :]
        x2y2 = (cxcy + half) * wh[None, :]
        return jnp.concatenate([x1y1, x2y2], axis=-1)          # absolute xyxy

    k_log, k_pb0, k_pb1, k_tb0, k_tb1, k_lab = jax.random.split(key, 6)

    pred_logits = jax.random.normal(k_log, (bs, num_queries, num_classes), jnp.float32)
    pred_boxes = jnp.stack([make_boxes(k_pb0, num_queries, img_wh[0]),
                            make_boxes(k_pb1, num_queries, img_wh[1])], axis=0)

    tgt_boxes = [make_boxes(k_tb0, sizes[0], img_wh[0]),
                 make_boxes(k_tb1, sizes[1], img_wh[1])]
    tgt_bbox = jnp.concatenate(tgt_boxes, axis=0)              # [T, 4]
    tgt_ids = jax.random.randint(k_lab, (total_t,), 0, num_classes)

    # image_size_xyxy per image -> repeated per query / per target
    img_xyxy = jnp.asarray(np.concatenate([img_wh, img_wh], axis=-1))       # [bs, 4]
    image_size_out = jnp.repeat(img_xyxy, num_queries, axis=0)              # [bs*nq, 4]
    image_size_tgt = jnp.concatenate(
        [jnp.tile(img_xyxy[i:i + 1], (sizes[i], 1)) for i in range(bs)], axis=0)  # [T, 4]

    c_ref = _reference_cost(pred_logits, pred_boxes, tgt_ids, tgt_bbox,
                            image_size_out, image_size_tgt)

    # --- exact (f32) compute path: matches the reference up to the approx EUP reciprocals
    c_f32 = hungarian_cost_matrix(pred_logits, pred_boxes, tgt_ids, tgt_bbox,
                                  image_size_out, image_size_tgt,
                                  compute_dtype=jnp.float32)
    c_f32 = jax.block_until_ready(c_f32)
    np.testing.assert_allclose(np.asarray(c_f32), np.asarray(c_ref),
                               rtol=5e-3, atol=5e-3)

    # --- default bf16 elementwise path (v6e/v7x): absolute pixel coordinates in bf16
    #     incur ~1% relative box-extent error (cancellation), so the cost matrix is only
    #     checked loosely here; use compute_dtype=float32 when exact costs are required.
    c_bf16 = hungarian_cost_matrix(pred_logits, pred_boxes, tgt_ids, tgt_bbox,
                                   image_size_out, image_size_tgt,
                                   compute_dtype=jnp.bfloat16)
    c_bf16 = jax.block_until_ready(c_bf16)
    err = np.abs(np.asarray(c_bf16) - np.asarray(c_ref))
    assert float(err.max()) < 0.3, f"bf16 max err too large: {err.max()}"
    assert float(err.mean()) < 0.08, f"bf16 mean err too large: {err.mean()}"

    # TODO(synk): per-image linear_sum_assignment on C.split(sizes) is host-side scipy
    #             (no Pallas equivalent); C is the kernel deliverable.
    print("KERNEL_OK")
</pallas_src>

<mosaic_0001>
module attributes {stable_mosaic.version = 11 : i64} {
  func.func @_cost_kernel(%arg0: i32, %arg1: memref<16x32xf32, #tpu.memory_space<vmem>>, %arg2: memref<32x128xf32, #tpu.memory_space<vmem>>, %arg3: memref<16x4xf32, #tpu.memory_space<vmem>>, %arg4: memref<4x128xf32, #tpu.memory_space<vmem>>, %arg5: memref<16x4xf32, #tpu.memory_space<vmem>>, %arg6: memref<4x128xf32, #tpu.memory_space<vmem>>, %arg7: memref<16x128xf32, #tpu.memory_space<vmem>>) attributes {dimension_semantics = [#tpu.dimension_semantics<parallel>], iteration_bounds = array<i64: 1>, scalar_prefetch = 0 : i64, scratch_operands = 0 : i64, tpu.core_type = #tpu.core_type<tc>, window_params = [{transform_indices = @transform_0, window_bounds = array<i64: 16, 32>}, {pipeline_mode = #tpu.pipeline_mode<synchronous>, transform_indices = @transform_1, window_bounds = array<i64: 32, 128>}, {transform_indices = @transform_2, window_bounds = array<i64: 16, 4>}, {pipeline_mode = #tpu.pipeline_mode<synchronous>, transform_indices = @transform_3, window_bounds = array<i64: 4, 128>}, {transform_indices = @transform_4, window_bounds = array<i64: 16, 4>}, {pipeline_mode = #tpu.pipeline_mode<synchronous>, transform_indices = @transform_5, window_bounds = array<i64: 4, 128>}, {transform_indices = @transform_6, window_bounds = array<i64: 16, 128>}]} {
    %c0 = arith.constant 0 : index
    %c0_0 = arith.constant 0 : index
    %0 = vector.load %arg1[%c0, %c0_0] : memref<16x32xf32, #tpu.memory_space<vmem>>, vector<16x32xf32>
    %cst = arith.constant dense<0xFF800000> : vector<16xf32>
    %1 = vector.multi_reduction <maximumf>, %0, %cst [1] : vector<16x32xf32> to vector<16xf32>
    %2 = vector.shape_cast %1 : vector<16xf32> to vector<16x1xf32>
    %3 = vector.broadcast %2 : vector<16x1xf32> to vector<16x32xf32>
    %4 = arith.subf %0, %3 : vector<16x32xf32>
    %5 = math.exp %4 : vector<16x32xf32>
    %cst_1 = arith.constant dense<0.000000e+00> : vector<16xf32>
    %6 = vector.multi_reduction <add>, %5, %cst_1 [1] : vector<16x32xf32> to vector<16xf32>
    %7 = vector.shape_cast %6 : vector<16xf32> to vector<16x1xf32>
    %8 = tpu.reciprocal %7 {approx = true} : vector<16x1xf32> -> vector<16x1xf32>
    %9 = vector.broadcast %8 : vector<16x1xf32> to vector<16x32xf32>
    %10 = arith.mulf %5, %9 : vector<16x32xf32>
    %c0_2 = arith.constant 0 : index
    %c0_3 = arith.constant 0 : index
    %11 = vector.load %arg2[%c0_2, %c0_3] : memref<32x128xf32, #tpu.memory_space<vmem>>, vector<32x128xf32>
    %cst_4 = arith.constant dense<0.000000e+00> : vector<16x128xf32>
    %12 = tpu.matmul %10, %11, %cst_4 {dimension_numbers = #tpu.dot_dimension_numbers<[1], [0], [0], [1], [0, 0, 1, 1], [], []>} : vector<16x32xf32>, vector<32x128xf32>, vector<16x128xf32> -> vector<16x128xf32>
    %c0_5 = arith.constant 0 : index
    %c0_6 = arith.constant 0 : index
    %13 = vector.load %arg3[%c0_5, %c0_6] : memref<16x4xf32, #tpu.memory_space<vmem>>, vector<16x4xf32>
    %c0_7 = arith.constant 0 : index
    %c0_8 = arith.constant 0 : index
    %14 = vector.load %arg4[%c0_7, %c0_8] : memref<4x128xf32, #tpu.memory_space<vmem>>, vector<4x128xf32>
    %c0_9 = arith.constant 0 : index
    %c0_10 = arith.constant 0 : index
    %15 = vector.load %arg5[%c0_9, %c0_10] : memref<16x4xf32, #tpu.memory_space<vmem>>, vector<16x4xf32>
    %16 = arith.mulf %13, %15 : vector<16x4xf32>
    %c0_11 = arith.constant 0 : index
    %c0_12 = arith.constant 0 : index
    %17 = vector.load %arg6[%c0_11, %c0_12] : memref<4x128xf32, #tpu.memory_space<vmem>>, vector<4x128xf32>
    %18 = arith.mulf %14, %17 : vector<4x128xf32>
    %19 = vector.extract_strided_slice %16 {offsets = [0, 0], sizes = [16, 1], strides = [1, 1]} : vector<16x4xf32> to vector<16x1xf32>
    %20 = vector.extract_strided_slice %18 {offsets = [0, 0], sizes = [1, 128], strides = [1, 1]} : vector<4x128xf32> to vector<1x128xf32>
    %21 = vector.broadcast %19 : vector<16x1xf32> to vector<16x128xf32>
    %22 = vector.broadcast %20 : vector<1x128xf32> to vector<16x128xf32>
    %23 = arith.subf %21, %22 : vector<16x128xf32>
    %24 = math.absf %23 : vector<16x128xf32>
    %25 = vector.extract_strided_slice %16 {offsets = [0, 1], sizes = [16, 1], strides = [1, 1]} : vector<16x4xf32> to vector<16x1xf32>
    %26 = vector.extract_strided_slice %18 {offsets = [1, 0], sizes = [1, 128], strides = [1, 1]} : vector<4x128xf32> to vector<1x128xf32>
    %27 = vector.broadcast %25 : vector<16x1xf32> to vector<16x128xf32>
    %28 = vector.broadcast %26 : vector<1x128xf32> to vector<16x128xf32>
    %29 = arith.subf %27, %28 : vector<16x128xf32>
    %30 = math.absf %29 : vector<16x128xf32>
    %31 = arith.addf %24, %30 : vector<16x128xf32>
    %32 = vector.extract_strided_slice %16 {offsets = [0, 2], sizes = [16, 1], strides = [1, 1]} : vector<16x4xf32> to vector<16x1xf32>
    %33 = vector.extract_strided_slice %18 {offsets = [2, 0], sizes = [1, 128], strides = [1, 1]} : vector<4x128xf32> to vector<1x128xf32>
    %34 = vector.broadcast %32 : vector<16x1xf32> to vector<16x128xf32>
    %35 = vector.broadcast %33 : vector<1x128xf32> to vector<16x128xf32>
    %36 = arith.subf %34, %35 : vector<16x128xf32>
    %37 = math.absf %36 : vector<16x128xf32>
    %38 = arith.addf %31, %37 : vector<16x128xf32>
    %39 = vector.extract_strided_slice %16 {offsets = [0, 3], sizes = [16, 1], strides = [1, 1]} : vector<16x4xf32> to vector<16x1xf32>
    %40 = vector.extract_strided_slice %18 {offsets = [3, 0], sizes = [1, 128], strides = [1, 1]} : vector<4x128xf32> to vector<1x128xf32>
    %41 = vector.broadcast %39 : vector<16x1xf32> to vector<16x128xf32>
    %42 = vector.broadcast %40 : vector<1x128xf32> to vector<16x128xf32>
    %43 = arith.subf %41, %42 : vector<16x128xf32>
    %44 = math.absf %43 : vector<16x128xf32>
    %45 = arith.addf %38, %44 : vector<16x128xf32>
    %46 = arith.addf %12, %45 : vector<16x128xf32>
    %47 = vector.extract_strided_slice %13 {offsets = [0, 0], sizes = [16, 1], strides = [1, 1]} : vector<16x4xf32> to vector<16x1xf32>
    %48 = vector.shape_cast %47 : vector<16x1xf32> to vector<16x1xf32>
    %49 = vector.broadcast %48 : vector<16x1xf32> to vector<16x128xf32>
    %50 = vector.extract_strided_slice %13 {offsets = [0, 1], sizes = [16, 1], strides = [1, 1]} : vector<16x4xf32> to vector<16x1xf32>
    %51 = vector.shape_cast %50 : vector<16x1xf32> to vector<16x1xf32>
    %52 = vector.broadcast %51 : vector<16x1xf32> to vector<16x128xf32>
    %53 = vector.extract_strided_slice %13 {offsets = [0, 2], sizes = [16, 1], strides = [1, 1]} : vector<16x4xf32> to vector<16x1xf32>
    %54 = vector.shape_cast %53 : vector<16x1xf32> to vector<16x1xf32>
    %55 = vector.broadcast %54 : vector<16x1xf32> to vector<16x128xf32>
    %56 = vector.extract_strided_slice %13 {offsets = [0, 3], sizes = [16, 1], strides = [1, 1]} : vector<16x4xf32> to vector<16x1xf32>
    %57 = vector.shape_cast %56 : vector<16x1xf32> to vector<16x1xf32>
    %58 = vector.broadcast %57 : vector<16x1xf32> to vector<16x128xf32>
    %59 = vector.extract_strided_slice %14 {offsets = [0, 0], sizes = [1, 128], strides = [1, 1]} : vector<4x128xf32> to vector<1x128xf32>
    %60 = vector.shape_cast %59 : vector<1x128xf32> to vector<1x128xf32>
    %61 = vector.broadcast %60 : vector<1x128xf32> to vector<16x128xf32>
    %62 = vector.extract_strided_slice %14 {offsets = [1, 0], sizes = [1, 128], strides = [1, 1]} : vector<4x128xf32> to vector<1x128xf32>
    %63 = vector.shape_cast %62 : vector<1x128xf32> to vector<1x128xf32>
    %64 = vector.broadcast %63 : vector<1x128xf32> to vector<16x128xf32>
    %65 = vector.extract_strided_slice %14 {offsets = [2, 0], sizes = [1, 128], strides = [1, 1]} : vector<4x128xf32> to vector<1x128xf32>
    %66 = vector.shape_cast %65 : vector<1x128xf32> to vector<1x128xf32>
    %67 = vector.broadcast %66 : vector<1x128xf32> to vector<16x128xf32>
    %68 = vector.extract_strided_slice %14 {offsets = [3, 0], sizes = [1, 128], strides = [1, 1]} : vector<4x128xf32> to vector<1x128xf32>
    %69 = vector.shape_cast %68 : vector<1x128xf32> to vector<1x128xf32>
    %70 = vector.broadcast %69 : vector<1x128xf32> to vector<16x128xf32>
    %71 = vector.extract_strided_slice %13 {offsets = [0, 2], sizes = [16, 1], strides = [1, 1]} : vector<16x4xf32> to vector<16x1xf32>
    %72 = vector.extract_strided_slice %13 {offsets = [0, 0], sizes = [16, 1], strides = [1, 1]} : vector<16x4xf32> to vector<16x1xf32>
    %73 = arith.subf %71, %72 : vector<16x1xf32>
    %74 = vector.extract_strided_slice %13 {offsets = [0, 3], sizes = [16, 1], strides = [1, 1]} : vector<16x4xf32> to vector<16x1xf32>
    %75 = vector.extract_strided_slice %13 {offsets = [0, 1], sizes = [16, 1], strides = [1, 1]} : vector<16x4xf32> to vector<16x1xf32>
    %76 = arith.subf %74, %75 : vector<16x1xf32>
    %77 = arith.mulf %73, %76 : vector<16x1xf32>
    %78 = vector.extract_strided_slice %14 {offsets = [2, 0], sizes = [1, 128], strides = [1, 1]} : vector<4x128xf32> to vector<1x128xf32>
    %79 = vector.extract_strided_slice %14 {offsets = [0, 0], sizes = [1, 128], strides = [1, 1]} : vector<4x128xf32> to vector<1x128xf32>
    %80 = arith.subf %78, %79 : vector<1x128xf32>
    %81 = vector.extract_strided_slice %14 {offsets = [3, 0], sizes = [1, 128], strides = [1, 1]} : vector<4x128xf32> to vector<1x128xf32>
    %82 = vector.extract_strided_slice %14 {offsets = [1, 0], sizes = [1, 128], strides = [1, 1]} : vector<4x128xf32> to vector<1x128xf32>
    %83 = arith.subf %81, %82 : vector<1x128xf32>
    %84 = arith.mulf %80, %83 : vector<1x128xf32>
    %85 = arith.minimumf %55, %67 : vector<16x128xf32>
    %86 = arith.maximumf %49, %61 : vector<16x128xf32>
    %87 = arith.subf %85, %86 : vector<16x128xf32>
    %cst_13 = arith.constant 0.000000e+00 : f32
    %88 = vector.broadcast %cst_13 : f32 to vector<16x128xf32>
    %89 = arith.maximumf %87, %88 : vector<16x128xf32>
    %90 = arith.minimumf %58, %70 : vector<16x128xf32>
    %91 = arith.maximumf %52, %64 : vector<16x128xf32>
    %92 = arith.subf %90, %91 : vector<16x128xf32>
    %cst_14 = arith.constant 0.000000e+00 : f32
    %93 = vector.broadcast %cst_14 : f32 to vector<16x128xf32>
    %94 = arith.maximumf %92, %93 : vector<16x128xf32>
    %95 = arith.mulf %89, %94 : vector<16x128xf32>
    %96 = vector.broadcast %77 : vector<16x1xf32> to vector<16x128xf32>
    %97 = vector.broadcast %84 : vector<1x128xf32> to vector<16x128xf32>
    %98 = arith.addf %96, %97 : vector<16x128xf32>
    %99 = arith.subf %98, %95 : vector<16x128xf32>
    %100 = tpu.reciprocal %99 {approx = true} : vector<16x128xf32> -> vector<16x128xf32>
    %101 = arith.mulf %95, %100 : vector<16x128xf32>
    %102 = arith.subf %46, %101 : vector<16x128xf32>
    %103 = arith.maximumf %55, %67 : vector<16x128xf32>
    %104 = arith.minimumf %49, %61 : vector<16x128xf32>
    %105 = arith.subf %103, %104 : vector<16x128xf32>
    %106 = arith.maximumf %58, %70 : vector<16x128xf32>
    %107 = arith.minimumf %52, %64 : vector<16x128xf32>
    %108 = arith.subf %106, %107 : vector<16x128xf32>
    %109 = arith.mulf %105, %108 : vector<16x128xf32>
    %110 = arith.subf %109, %99 : vector<16x128xf32>
    %111 = tpu.reciprocal %109 {approx = true} : vector<16x128xf32> -> vector<16x128xf32>
    %112 = arith.mulf %110, %111 : vector<16x128xf32>
    %113 = arith.addf %102, %112 : vector<16x128xf32>
    %c0_15 = arith.constant 0 : index
    %c0_16 = arith.constant 0 : index
    %114 = vector.load %arg7[%c0_15, %c0_16] : memref<16x128xf32, #tpu.memory_space<vmem>>, vector<16x128xf32>
    tpu.vector_store %arg7[%c0_15, %c0_16], %113 {strides = array<i32>} : memref<16x128xf32, #tpu.memory_space<vmem>>, vector<16x128xf32>,
    return
  }
  func.func @transform_0(%arg0: i32) -> (i32, i32) {
    %c0_i32 = arith.constant 0 : i32
    %c0_i32_0 = arith.constant 0 : i32
    return %arg0, %c0_i32 : i32, i32
  }
  func.func @transform_1(%arg0: i32) -> (i32, i32) {
    %c0_i32 = arith.constant 0 : i32
    %c0_i32_0 = arith.constant 0 : i32
    %c0_i32_1 = arith.constant 0 : i32
    return %c0_i32, %c0_i32_0 : i32, i32
  }
  func.func @transform_2(%arg0: i32) -> (i32, i32) {
    %c0_i32 = arith.constant 0 : i32
    %c0_i32_0 = arith.constant 0 : i32
    return %arg0, %c0_i32 : i32, i32
  }
  func.func @transform_3(%arg0: i32) -> (i32, i32) {
    %c0_i32 = arith.constant 0 : i32
    %c0_i32_0 = arith.constant 0 : i32
    %c0_i32_1 = arith.constant 0 : i32
    return %c0_i32, %c0_i32_0 : i32, i32
  }
  func.func @transform_4(%arg0: i32) -> (i32, i32) {
    %c0_i32 = arith.constant 0 : i32
    %c0_i32_0 = arith.constant 0 : i32
    return %arg0, %c0_i32 : i32, i32
  }
  func.func @transform_5(%arg0: i32) -> (i32, i32) {
    %c0_i32 = arith.constant 0 : i32
    %c0_i32_0 = arith.constant 0 : i32
    %c0_i32_1 = arith.constant 0 : i32
    return %c0_i32, %c0_i32_0 : i32, i32
  }
  func.func @transform_6(%arg0: i32) -> (i32, i32) {
    %c0_i32 = arith.constant 0 : i32
    %c0_i32_0 = arith.constant 0 : i32
    return %arg0, %c0_i32 : i32, i32
  }
}

</mosaic_0001>

<bundles_post_ra>
// kernel: tpu_custom_call.1
= control target key start
LH: loop header
LB: loop body
LE: loop exit
PB: predicated region body
PF: predicated region fallthrough
CT: control target
= control target key end

     0   :  { %11 = vsyncpa [#allocation3], 0  ;;  %s607_s0 = inlined_call_operand.hbm [shape: f32[16,32], index: 0, kind: input, shape index: {}]   ;;  %s608_s1 = inlined_call_operand.vmem [shape: f32[32,128], index: 1, kind: input, shape index: {}]   ;;  %s609_s2 = inlined_call_operand.vmem [shape: f32[16,4], index: 2, kind: input, shape index: {}]   ;;  %s610_s3 = inlined_call_operand.vmem [shape: f32[4,128], index: 3, kind: input, shape index: {}]   ;;  %s611_s4 = inlined_call_operand.vmem [shape: f32[16,4], index: 4, kind: input, shape index: {}]   ;;  %s612_s5 = inlined_call_operand.vmem [shape: f32[4,128], index: 5, kind: input, shape index: {}]   ;;  %s613_s6 = inlined_call_operand.hbm [shape: f32[16,128], index: 6, kind: output, shape index: {}]  }
   0x1   :  { %12 = vsyncpa [#allocation4], 0  ;;  %s492_s21 = smov [#allocation2]  }
   0x2   :  { %s18_s22 = sshll.u32 %s492_s21, 4  ;;  %s19_s22 = int_to_ptr.vmem [resolvable:$true] %s18_s22 }
   0x3   :  { %s456_s23 = scalar_lea.vmem %s19_s22, 256  ;;  %p461_p1 = scmp.lt.s32.totalorder %s19_s22, %s19_s22 }
   0x4   :  { %p457_p0 = scmp.ne.s32.totalorder %s19_s22, %s456_s23  ;;  %p462_p2 = scmp.lt.s32.totalorder %s456_s23, %s456_s23 }
   0x6   :  { %p463_p3 = por %p462_p2, %p461_p1 }
   0x8   :  { %p464_p4 = pnand %p463_p3, %p457_p0 }
   0xa   :  { %467 = shalt.err (!%p464_p4)
}
   0xb   :  { %s493_s24 = smov 128   ;;  %s494_s25 = smov 8  }
   0xc   :  { %24 = dma.hbm_to_vmem [thread:$0]  %s607_s0, 256, %s19_s22, [#allocation3], %s493_s24, %s493_s24, %s494_s25  }
   0xd   :  { %488 = dma.done.wait [#allocation3], 256  }
   0xe   :  { %489 = vsyncadd [#allocation3], 4294967040  ;;  %vm40_vm0 = vcmask 261120   ;;  %v38_v0 = vld [vmem:[#allocation2] sm:$0xff]  ;;  %v39_v1 = vld [vmem:[#allocation2 + $0x8] sm:$0xff]  ;;  %s495_s30 = smov 2   ;;  %v86_v46 = vlaneseq }
   0xf   :  { %v41_v2 = vsel %vm40_vm0, %v38_v0, -inf  ;;  %v44_v3 = vsel %vm40_vm0, %v39_v1, -inf  ;;  %v548_v4 = vld [vmem:[%s609_s2] sm:$0xff]  ;;  %v68_v15 = vld [vmem:[%s609_s2 + $0x8] sm:$0xff]  ;;  %v66_v18 = vld [vmem:[%s608_s1 + $0x18] sm:$0xff]  ;;  %v496_v20 = vmov 0  }
  0x10   :  { %42 = vmax.xlane.f32.xlu0 %v41_v2  ;;  %396 = vmatprep.subr.mxu0 %v66_v18  ;;  %v65_v19 = vld [vmem:[%s608_s1 + $0x10] sm:$0xff]  ;;  %v64_v21 = vld [vmem:[%s608_s1 + $0x8] sm:$0xff]  ;;  %s497_s2 = smov 127   ;;  %v63_v22 = vld [vmem:[%s608_s1] sm:$0xff]  ;;  %v498_v23 = vmov 1   ;;  %v499_v24 = vmov 3  }
  0x11   :  { %418 = vset.pattern.permute.xlu1 %v496_v20  ;;  %397 = vmatpush3.msra.mxu0 %v66_v18  ;;  %v500_v25 = vmov 2   ;;  %v70_v34 = vld [vmem:[%s611_s4] sm:$0xff]  ;;  %v71_v36 = vld [vmem:[%s611_s4 + $0x8] sm:$0xff]  ;;  %v582_v48 = vshrl.u32 %v86_v46, 7 }
  0x12   :  { %398 = vmatprep.subr.mxu0 %v65_v19  ;;  %417 = vset.pattern.permute.xlu0 %v496_v20  ;;  %v72_v35 = vmul.f32 %v70_v34, %v548_v4  ;;  %v73_v37 = vmul.f32 %v71_v36, %v68_v15  ;;  %v69_v50 = vld [vmem:[%s610_s3] sm:$0xf] }
  0x13   :  { %399 = vmatpush3.msra.mxu0 %v65_v19  ;;  %v298_v51 = vrot.slane %v69_v50, 6  ;;  %v88_v52 = vsub.s32 0, %v582_v48  ;;  %v104_v54 = vsub.s32 1, %v582_v48  ;;  %v122_v55 = vsub.s32 2, %v582_v48 }
  0x14   :  { %45 = vmax.xlane.f32.xlu0 %v44_v3  ;;  %400 = vmatprep.subr.mxu0 %v64_v21  ;;  %v140_v56 = vsub.s32 3, %v582_v48 }
  0x15   :  { %401 = vmatpush3.msra.mxu0 %v64_v21  ;;  %v300_v58 = vsub.f32 %v69_v50, %v298_v51  ;;  %v266_v59 = vrot.slane %v69_v50, %v88_v52  ;;  %v270_v60 = vrot.slane %v69_v50, %v104_v54  ;;  %v274_v61 = vrot.slane %v69_v50, %v122_v55 }
  0x16   :  { %402 = vmatprep.subr.mxu0 %v63_v22  ;;  %v278_v62 = vrot.slane %v69_v50, %v140_v56 }
  0x17   :  { %403 = vmatpush3.msra.mxu0 %v63_v22 }
  0x2a   :  { %279 = vrot.lane.b32.xlu0 %v548_v4, %s495_s30 }
  0x2e   :  { %231 = vperm.xlu0 %417, %v548_v4  }
  0x32   :  { %420 = vset.pattern.permute.xlu0 %v498_v23 }
  0x33   :  { %244 = vperm.xlu0 %420, %v68_v15  }
  0x37   :  { %422 = vset.pattern.permute.xlu0 %v499_v24 }
  0x38   :  { %256 = vperm.xlu0 %422, %v548_v4  }
  0x3c   :  { %426 = vset.pattern.permute.xlu0 %v500_v25 }
  0x99   :  { %v43_v5 = vpop.xlane.xlu0 %42 }
  0x9a   :  { %v47_v6 = vsub.f32 %v38_v0, %v43_v5 }
  0x9c   :  { %v49_v7 = vmul.f32 1.442695, %v47_v6 }
  0x9d   :  { %v46_v8 = vpop.xlane.xlu0 %45 }
  0x9e   :  { %432 = vpow2.f32 %v49_v7  ;;  %v48_v9 = vsub.f32 %v39_v1, %v46_v8 }
  0xa0   :  { %v51_v10 = vmul.f32 1.442695, %v48_v9 }
  0xa1   :  { %v280_v16 = vpop.permute.xlu0 %279 }
  0xa2   :  { %434 = vpow2.f32 %v51_v10  ;;  %v285_v17 = vsub.f32 %v548_v4, %v280_v16 }
  0xa9   :  { %v232_v47 = vpop.permute.xlu0 %231 }
  0xaa   :  { %v307_v63 = vmax.f32 %v232_v47, %v266_v59  ;;  %v349_v18 = vmin.f32 %v232_v47, %v266_v59 }
  0xab   :  { %v433_v11 = vpop.eup %432 }
  0xac   :  { %v53_v12 = vsel %vm40_vm0, %v433_v11, 0.0 }
  0xad   :  { %54 = vadd.xlane.f32.xlu1 %v53_v12 }
  0xae   :  { %v245_v53 = vpop.permute.xlu0 %244 }
  0xaf   :  { %v435_v13 = vpop.eup %434 }
  0xb0   :  { %v56_v14 = vsel %vm40_vm0, %v435_v13, 0.0 }
  0xb1   :  { %57 = vadd.xlane.f32.xlu1 %v56_v14  ;;  %v316_v14 = vmax.f32 %v245_v53, %v270_v60 }
  0xb3   :  { %v257_v0 = vpop.permute.xlu0 %256 }
  0xb4   :  { %v313_v3 = vmin.f32 %v257_v0, %v278_v62 }
  0xc2   :  { %281 = vrot.lane.b32.xlu1 %v68_v15, %s495_s30 }
  0xc6   :  { %289 = vrot.lane.b32.xlu1 %v285_v17, %s497_s2 }
 0x136   :  { %v55_v26 = vpop.xlane.xlu1 %54 }
 0x137   :  { %436 = vrcp.f32 %v55_v26  ;;  %v74_v26 = vld [vmem:[%s612_s5] sm:$0xf]  ;;  %s501_s5 = smov [#allocation5]  }
 0x138   :  { %s376_s21 = sshll.u32 %s501_s5, 4  ;;  %s377_s21 = int_to_ptr.vmem [resolvable:$true] %s376_s21 }
 0x139   :  { %s468_s22 = scalar_lea.vmem %s377_s21, 256  ;;  %p473_p6 = scmp.lt.s32.totalorder %s377_s21, %s377_s21 }
 0x13a   :  { %v58_v27 = vpop.xlane.xlu1 %57  ;;  %p469_p5 = scmp.ne.s32.totalorder %s377_s21, %s468_s22  ;;  %p474_p7 = scmp.lt.s32.totalorder %s468_s22, %s468_s22 }
 0x13b   :  { %438 = vrcp.f32 %v58_v27 }
 0x13c   :  { %p475_p8 = por %p474_p7, %p473_p6 }
 0x13e   :  { %v282_v28 = vpop.permute.xlu1 %281  ;;  %p476_p9 = pnand %p475_p8, %p469_p5 }
 0x13f   :  { %v286_v29 = vsub.f32 %v68_v15, %v282_v28 }
 0x141   :  { %291 = vrot.lane.b32.xlu1 %v286_v29, %s497_s2 }
 0x142   :  { %v290_v38 = vpop.permute.xlu1 %289 }
 0x143   :  { %v295_v39 = vmul.f32 %v290_v38, %v285_v17 }
 0x144   :  { %v437_v30 = vpop.eup %436 }
 0x145   :  { %236 = vperm.xlu1 %418, %v68_v15   ;;  %v61_v31 = vmul.f32 %v437_v30, %v433_v11  ;;  %v356_v30 = vmin.f32 %v245_v53, %v270_v60 }
 0x147   :  { %404 = vmatprep.mubr.msk.f32.mxu0 %vm40_vm0, %v61_v31 }
 0x148   :  { %v439_v32 = vpop.eup %438 }
 0x149   :  { %419 = vset.pattern.permute.xlu1 %v498_v23  ;;  %v62_v33 = vmul.f32 %v439_v32, %v435_v13 }
 0x14a   :  { %240 = vperm.xlu1 %419, %v548_v4  }
 0x14b   :  { %405 = vmatmul.mubr.msk.f32.vlgmr.msra.gmra.mxu0 %vm40_vm0, %v62_v33  ;;  %v75_v33 = vmul.f32 %v74_v26, %v69_v50 }
 0x14d   :  { %v141_v48 = vrot.slane %v75_v33, %v140_v56 }
 0x14e   :  { %421 = vset.pattern.permute.xlu1 %v500_v25 }
 0x14f   :  { %248 = vperm.xlu1 %421, %v548_v4   ;;  %v302_v4 = vrot.slane %v300_v58, 1 }
 0x151   :  { %v304_v8 = vmul.f32 %v302_v4, %v300_v58 }
 0x153   :  { %252 = vperm.xlu1 %421, %v68_v15   ;;  %v336_v11 = vrot.slane %v304_v8, %v122_v55 }
 0x157   :  { %423 = vset.pattern.permute.xlu1 %v499_v24 }
 0x158   :  { %260 = vperm.xlu1 %423, %v68_v15  }
 0x15c   :  { %424 = vset.pattern.permute.xlu1 %v496_v20  ;;  %v353_v20 = vmax.f32 %v257_v0, %v278_v62 }
 0x15d   :  { %78 = vperm.xlu1 %424, %v72_v35  }
 0x161   :  { %83 = vperm.xlu1 %424, %v73_v37  }
 0x165   :  { %425 = vset.pattern.permute.xlu1 %v500_v25 }
 0x166   :  { %325 = vperm.xlu1 %425, %v295_v39  }
 0x16a   :  { %428 = vset.pattern.permute.xlu1 %v498_v23 }
 0x16b   :  { %99 = vperm.xlu1 %428, %v73_v37  }
 0x16f   :  { %429 = vset.pattern.permute.xlu1 %v500_v25 }
 0x170   :  { %113 = vperm.xlu1 %429, %v72_v35  }
 0x174   :  { %431 = vset.pattern.permute.xlu1 %v499_v24 }
 0x175   :  { %131 = vperm.xlu1 %431, %v72_v35  }
 0x179   :  { %135 = vperm.xlu1 %431, %v73_v37  }
 0x1b3   :  { %v292_v40 = vpop.permute.xlu1 %291 }
 0x1b4   :  { %v296_v41 = vmul.f32 %v292_v40, %v286_v29 }
 0x1b6   :  { %330 = vperm.xlu0 %426, %v296_v41   ;;  %v89_v41 = vrot.slane %v75_v33, %v88_v52 }
 0x1ba   :  { %427 = vset.pattern.permute.xlu0 %v498_v23 }
 0x1bb   :  { %95 = vperm.xlu0 %427, %v72_v35  }
 0x1bf   :  { %430 = vset.pattern.permute.xlu0 %v500_v25 }
 0x1c0   :  { %117 = vperm.xlu0 %430, %v73_v37   ;;  %v237_v42 = vpop.permute.xlu1 %236 }
 0x1c1   :  { %v308_v13 = vmax.f32 %v237_v42, %v266_v59  ;;  %v350_v29 = vmin.f32 %v237_v42, %v266_v59  ;;  %v123_v42 = vrot.slane %v75_v33, %v122_v55 }
 0x1c5   :  { %v241_v43 = vpop.permute.xlu1 %240 }
 0x1c6   :  { %v315_v1 = vmax.f32 %v241_v43, %v270_v60  ;;  %v355_v17 = vmin.f32 %v241_v43, %v270_v60 }
 0x1c8   :  { %v317_v7 = vsub.f32 %v313_v3, %v315_v1  ;;  %v357_v28 = vsub.f32 %v353_v20, %v355_v17 }
 0x1ca   :  { %v249_v44 = vpop.permute.xlu1 %248  ;;  %v319_v10 = vmax.f32 %v317_v7, 0.0 }
 0x1cb   :  { %v305_v2 = vmin.f32 %v249_v44, %v274_v61  ;;  %v347_v19 = vmax.f32 %v249_v44, %v274_v61  ;;  %v105_v44 = vrot.slane %v75_v33, %v104_v54 }
 0x1cd   :  { %v309_v6 = vsub.f32 %v305_v2, %v307_v63  ;;  %v351_v27 = vsub.f32 %v347_v19, %v349_v18 }
 0x1ce   :  { %v253_v45 = vpop.permute.xlu1 %252 }
 0x1cf   :  { %v311_v9 = vmax.f32 %v309_v6, 0.0  ;;  %v306_v15 = vmin.f32 %v253_v45, %v274_v61  ;;  %v348_v31 = vmax.f32 %v253_v45, %v274_v61  ;;  %v359_v38 = vmul.f32 %v357_v28, %v351_v27 }
 0x1d1   :  { %v593_v21 = vmul.f32 %v319_v10, %v311_v9  ;;  %v310_v24 = vsub.f32 %v306_v15, %v308_v13  ;;  %v352_v39 = vsub.f32 %v348_v31, %v350_v29 }
 0x1d3   :  { %v261_v49 = vpop.permute.xlu1 %260  ;;  %v312_v36 = vmax.f32 %v310_v24, 0.0 }
 0x1d4   :  { %v314_v16 = vmin.f32 %v261_v49, %v278_v62  ;;  %v354_v32 = vmax.f32 %v261_v49, %v278_v62 }
 0x1d6   :  { %v318_v25 = vsub.f32 %v314_v16, %v316_v14  ;;  %v358_v40 = vsub.f32 %v354_v32, %v356_v30 }
 0x1d8   :  { %v591_v57 = vpop.permute.xlu1 %78  ;;  %v320_v37 = vmax.f32 %v318_v25, 0.0  ;;  %v360_v49 = vmul.f32 %v358_v40, %v352_v39 }
 0x1d9   :  { %v90_v51 = vsub.f32 %v591_v57, %v89_v41 }
 0x1da   :  { %v322_v46 = vmul.f32 %v320_v37, %v312_v36 }
 0x1db   :  { %v92_v62 = vand.u32 2147483647, %v90_v51 }
 0x1dc   :  { %v84_v5 = vpop.permute.xlu1 %83 }
 0x1dd   :  { %v91_v53 = vsub.f32 %v84_v5, %v89_v41 }
 0x1df   :  { %v93_v0 = vand.u32 2147483647, %v91_v53 }
 0x1e1   :  { %v326_v12 = vpop.permute.xlu1 %325 }
 0x1e2   :  { %v337_v22 = vadd.f32 %v336_v11, %v326_v12 }
 0x1e4   :  { %v339_v34 = vsub.f32 %v337_v22, %v593_v21 }
 0x1e6   :  { %v100_v23 = vpop.permute.xlu1 %99  ;;  %440 = vrcp.f32 %v339_v34  ;;  %v361_v10 = vsub.f32 %v359_v38, %v339_v34 }
 0x1e7   :  { %442 = vrcp.f32 %v359_v38  ;;  %v107_v58 = vsub.f32 %v100_v23, %v105_v44 }
 0x1e9   :  { %v109_v1 = vand.u32 2147483647, %v107_v58 }
 0x1eb   :  { %v114_v35 = vpop.permute.xlu1 %113  ;;  %v111_v8 = vadd.f32 %v109_v1, %v93_v0 }
 0x1ec   :  { %v124_v60 = vsub.f32 %v114_v35, %v123_v42 }
 0x1ee   :  { %v126_v55 = vand.u32 2147483647, %v124_v60 }
 0x1f0   :  { %v132_v45 = vpop.permute.xlu1 %131 }
 0x1f1   :  { %v142_v61 = vsub.f32 %v132_v45, %v141_v48 }
 0x1f3   :  { %v144_v56 = vand.u32 2147483647, %v142_v61  ;;  %v441_v7 = vpop.eup %440 }
 0x1f4   :  { %v136_v63 = vpop.permute.xlu1 %135  ;;  %v443_v12 = vpop.eup %442  ;;  %v343_v16 = vmul.f32 %v441_v7, %v593_v21 }
 0x1f5   :  { %v143_v6 = vsub.f32 %v136_v63, %v141_v48  ;;  %v365_v22 = vmul.f32 %v443_v12, %v361_v10 }
 0x1f7   :  { %v145_v14 = vand.u32 2147483647, %v143_v6 }
 0x20b   :  { %v406_v4 = vpop.f32.mrf.mxu0 }
 0x20d   :  { %v220_v13 = vpop.f32.mrf.mxu0 }
 0x231   :  { %v331_v43 = vpop.permute.xlu0 %330 }
 0x232   :  { %v338_v47 = vadd.f32 %v336_v11, %v331_v43 }
 0x234   :  { %v340_v50 = vsub.f32 %v338_v47, %v322_v46 }
 0x236   :  { %444 = vrcp.f32 %v340_v50  ;;  %v96_v59 = vpop.permute.xlu0 %95  ;;  %v362_v18 = vsub.f32 %v360_v49, %v340_v50 }
 0x237   :  { %v106_v52 = vsub.f32 %v96_v59, %v105_v44  ;;  %446 = vrcp.f32 %v360_v49 }
 0x239   :  { %v108_v54 = vand.u32 2147483647, %v106_v52 }
 0x23b   :  { %v110_v2 = vadd.f32 %v108_v54, %v92_v62  ;;  %v118_v3 = vpop.permute.xlu0 %117 }
 0x23c   :  { %v125_v57 = vsub.f32 %v118_v3, %v123_v42 }
 0x23d   :  { %v128_v5 = vadd.f32 %v126_v55, %v110_v2 }
 0x23e   :  { %v127_v9 = vand.u32 2147483647, %v125_v57 }
 0x23f   :  { %v146_v11 = vadd.f32 %v144_v56, %v128_v5 }
 0x240   :  { %v129_v15 = vadd.f32 %v127_v9, %v111_v8 }
 0x241   :  { %v221_v17 = vadd.f32 %v220_v13, %v146_v11 }
 0x242   :  { %v147_v19 = vadd.f32 %v145_v14, %v129_v15 }
 0x243   :  { %v445_v20 = vpop.eup %444  ;;  %v345_v23 = vsub.f32 %v221_v17, %v343_v16 }
 0x244   :  { %v344_v24 = vmul.f32 %v445_v20, %v322_v46  ;;  %v226_v25 = vadd.f32 %v406_v4, %v147_v19  ;;  %v447_v26 = vpop.eup %446 }
 0x245   :  { %v367_v27 = vadd.f32 %v365_v22, %v345_v23  ;;  %v366_v28 = vmul.f32 %v447_v26, %v362_v18 }
 0x246   :  { %v346_v29 = vsub.f32 %v226_v25, %v344_v24 }
 0x247   :  { %369 = vst [vmem:[#allocation5] sm:$0xff] %v367_v27 }
 0x248   :  { %v368_v30 = vadd.f32 %v366_v28, %v346_v29 }
 0x24a   :  { %370 = vst [vmem:[#allocation5 + $0x8] sm:$0xff] %v368_v30 }
 0x24b   :  { %479 = shalt.err (!%p476_p9)
}
 0x24c   :  { %382 = dma.vmem_to_hbm [thread:$0]  %s377_s21, 256, %s613_s6, [#allocation4], %s493_s24, %s493_s24, %s494_s25  }
 0x24d   :  { %490 = dma.done.wait [#allocation4], 256  }
 0x24e   :  { %491 = vsyncadd [#allocation4], 4294967040 }
 0x24f   :  { %386 = vsyncpa [#allocation3], 1 }
 0x250   :  { %387 = vsyncpa [#allocation4], 1 }

</bundles_post_ra>
